<compile_context>
chip_gen: v7x
topology: tpu7x:2x2x1
jax: 0.10.0
libtpu: 0.0.40
codegen_flags: <defaults>
</compile_context>

<pallas_src>
import jax
import jax.numpy as jnp
from jax.experimental import pallas as pl
from jax.experimental.pallas import tpu as pltpu


def _round_up(x, m):
    return ((x + m - 1) // m) * m


def _critic_kernel(x_ref, w1_ref, b1_ref, w2_ref, b2_ref, wq_ref, bq_ref, q_ref):
    # fc1: single MXU pass over the fused [state | action] input.
    h1 = jnp.dot(x_ref[...], w1_ref[...], preferred_element_type=jnp.float32)
    h1 = jnp.maximum(h1 + b1_ref[...], 0.0).astype(w2_ref.dtype)   # f32 epilogue -> bf16
    # fc2
    h2 = jnp.dot(h1, w2_ref[...], preferred_element_type=jnp.float32)
    h2 = jnp.maximum(h2 + b2_ref[...], 0.0)                        # keep f32 for q head
    # q head: rank-1 contraction on VPU (mul) + XLU (lane reduce) — no MXU pass,
    # no 128-lane zero-padded writeback.
    q = jnp.sum(h2 * wq_ref[...], axis=-1, keepdims=True)          # [tm, 1]
    q_ref[...] = (q + bq_ref[...]).astype(q_ref.dtype)


def prepare_params(params, compute_dtype=jnp.bfloat16):
    """One-time weight layout/cast for critic_forward (hoisted out of the call path)."""
    fc2 = params["w2"].shape[1]
    return {
        "w1": params["w1"].astype(compute_dtype),                # [in_dim, fc1]
        "b1": params["b1"].reshape(1, -1).astype(jnp.float32),   # [1, fc1]
        "w2": params["w2"].astype(compute_dtype),                # [fc1, fc2]
        "b2": params["b2"].reshape(1, -1).astype(jnp.float32),   # [1, fc2]
        "wq": params["wq"].reshape(1, fc2).astype(jnp.float32),  # [1, fc2] row
        "bq": params["bq"].reshape(1, 1).astype(jnp.float32),    # [1, 1]
    }


def _choose_tile(batch, tile_m):
    """Rows per grid step: multiple of 8 (or the full batch) and >= 2 grid steps
    when the batch is big enough, so v7x's two TensorCores both get work."""
    if batch <= 8:
        return batch, batch                                # one full-batch tile, no pad
    tm = min(tile_m, _round_up(pl.cdiv(batch, 2), 8))
    return tm, _round_up(batch, tm)


def critic_forward(state, action, prepared, *, tile_m=1024):
    """Pallas forward pass of the SAC CriticNetwork.

    state:    [B, state_dim] float32
    action:   [B, n_actions] float32
    prepared: output of prepare_params()
    returns:  q [B, 1] float32
    """
    B = state.shape[0]
    in_dim, fc1 = prepared["w1"].shape
    fc2 = prepared["w2"].shape[1]
    compute_dtype = prepared["w1"].dtype
    assert state.shape[1] + action.shape[1] == in_dim

    # Fused layer-1 input; the concat costs ~in_dim*2 bytes/row (negligible) and
    # lets layer 1 run as a single MXU pass.
    x = jnp.concatenate([state, action], axis=1).astype(compute_dtype)

    tm, b_pad = _choose_tile(B, tile_m)
    if b_pad != B:                       # pad only when the tile doesn't divide B
        x = jnp.zeros((b_pad, in_dim), compute_dtype).at[:B].set(x)

    grid = (b_pad // tm,)

    def const_spec(arr):
        return pl.BlockSpec(arr.shape, lambda i: (0,) * arr.ndim)

    flops = 2 * b_pad * (in_dim * fc1 + fc1 * fc2 + fc2)
    bytes_accessed = (x.size * x.dtype.itemsize
                      + sum(prepared[k].size * prepared[k].dtype.itemsize
                            for k in ("w1", "b1", "w2", "b2", "wq", "bq"))
                      + b_pad * 4)

    out = pl.pallas_call(
        _critic_kernel,
        out_shape=jax.ShapeDtypeStruct((b_pad, 1), jnp.float32),
        grid=grid,
        in_specs=[
            pl.BlockSpec((tm, in_dim), lambda i: (i, 0)),     # x tile
            const_spec(prepared["w1"]),
            const_spec(prepared["b1"]),
            const_spec(prepared["w2"]),
            const_spec(prepared["b2"]),
            const_spec(prepared["wq"]),
            const_spec(prepared["bq"]),
        ],
        out_specs=pl.BlockSpec((tm, 1), lambda i: (i, 0)),
        compiler_params=pltpu.CompilerParams(
            dimension_semantics=("parallel",)),
        cost_estimate=pl.CostEstimate(
            flops=flops, transcendentals=0, bytes_accessed=bytes_accessed),
    )(x, prepared["w1"], prepared["b1"], prepared["w2"], prepared["b2"],
      prepared["wq"], prepared["bq"])

    return out[:B]


def init_params(key, state_dim, n_actions, fc1_dims=256, fc2_dims=256):
    """Deterministic init mirroring torch.nn.Linear default U(-1/sqrt(fan_in), 1/sqrt(fan_in))."""
    def linear(k, fan_in, fan_out):
        kw, kb = jax.random.split(k)
        bound = 1.0 / jnp.sqrt(jnp.float32(fan_in))
        w = jax.random.uniform(kw, (fan_in, fan_out), jnp.float32, -bound, bound)
        b = jax.random.uniform(kb, (1, fan_out), jnp.float32, -bound, bound)
        return w, b

    k1, k2, k3 = jax.random.split(key, 3)
    in_dim = state_dim + n_actions
    w1, b1 = linear(k1, in_dim, fc1_dims)
    w2, b2 = linear(k2, fc1_dims, fc2_dims)
    wq, bq = linear(k3, fc2_dims, 1)
    return {"w1": w1, "b1": b1, "w2": w2, "b2": b2, "wq": wq, "bq": bq}


def _reference_forward(state, action, params, operand_dtype=jnp.float32):
    """Pure-JAX reference. operand_dtype=bf16 emulates the kernel's precision."""
    x = jnp.concatenate([state, action], axis=1).astype(operand_dtype)
    w1 = params["w1"].astype(operand_dtype)
    w2 = params["w2"].astype(operand_dtype)
    h1 = jnp.dot(x, w1, preferred_element_type=jnp.float32) + params["b1"].reshape(1, -1)
    h1 = jnp.maximum(h1, 0.0).astype(operand_dtype)
    h2 = jnp.dot(h1, w2, preferred_element_type=jnp.float32) + params["b2"].reshape(1, -1)
    h2 = jnp.maximum(h2, 0.0)
    wq = params["wq"].reshape(1, -1).astype(jnp.float32)
    return jnp.sum(h2 * wq, axis=-1, keepdims=True) + params["bq"].reshape(1, 1)


if __name__ == "__main__":
    # Small shapes consistent with the module: state_dim=8, n_actions=4, batch=2.
    B, STATE_DIM, N_ACTIONS = 2, 8, 4
    FC1, FC2 = 256, 256

    key = jax.random.PRNGKey(0)
    k_params, k_state, k_action = jax.random.split(key, 3)

    params = init_params(k_params, STATE_DIM, N_ACTIONS, FC1, FC2)
    prepared = prepare_params(params)            # one-time layout/cast (hoisted)

    state = jax.random.normal(k_state, (B, STATE_DIM), jnp.float32)
    action = jax.random.normal(k_action, (B, N_ACTIONS), jnp.float32)

    q = jax.block_until_ready(critic_forward(state, action, prepared))
    assert q.shape == (B, 1)

    # Tight check against a precision-matched (bf16 operand / f32 accum) reference.
    q_ref_bf16 = _reference_forward(state, action, params, operand_dtype=jnp.bfloat16)
    assert jnp.allclose(q, q_ref_bf16, atol=2e-3, rtol=2e-3), (
        f"mismatch vs bf16 reference: {jnp.max(jnp.abs(q - q_ref_bf16))}")

    # Loose check against the full-f32 PyTorch-equivalent reference.
    q_ref_f32 = _reference_forward(state, action, params, operand_dtype=jnp.float32)
    assert jnp.allclose(q, q_ref_f32, atol=5e-2, rtol=5e-2), (
        f"mismatch vs f32 reference: {jnp.max(jnp.abs(q - q_ref_f32))}")

    # Also exercise the multi-tile / padded-batch path (grid > 1, B % tm != 0).
    B2 = 20
    k_s2, k_a2 = jax.random.split(jax.random.PRNGKey(1))
    state2 = jax.random.normal(k_s2, (B2, STATE_DIM), jnp.float32)
    action2 = jax.random.normal(k_a2, (B2, N_ACTIONS), jnp.float32)
    q2 = jax.block_until_ready(critic_forward(state2, action2, prepared))
    assert q2.shape == (B2, 1)
    q2_ref = _reference_forward(state2, action2, params, operand_dtype=jnp.bfloat16)
    assert jnp.allclose(q2, q2_ref, atol=2e-3, rtol=2e-3), (
        f"tiled-path mismatch: {jnp.max(jnp.abs(q2 - q2_ref))}")

    # TODO(synk): Adam optimizer state and checkpoint save/load are host-side
    # training utilities, not part of the forward pass — not kernelized.
    print("KERNEL_OK")
</pallas_src>

<mosaic_0001>
module attributes {stable_mosaic.version = 11 : i64} {
  func.func @_critic_kernel(%arg0: i32, %arg1: memref<2x12xbf16, #tpu.memory_space<vmem>>, %arg2: memref<12x256xbf16, #tpu.memory_space<vmem>>, %arg3: memref<1x256xf32, #tpu.memory_space<vmem>>, %arg4: memref<256x256xbf16, #tpu.memory_space<vmem>>, %arg5: memref<1x256xf32, #tpu.memory_space<vmem>>, %arg6: memref<1x256xf32, #tpu.memory_space<vmem>>, %arg7: memref<1x1xf32, #tpu.memory_space<vmem>>, %arg8: memref<2x1xf32, #tpu.memory_space<vmem>>) attributes {dimension_semantics = [#tpu.dimension_semantics<parallel>], iteration_bounds = array<i64: 1>, scalar_prefetch = 0 : i64, scratch_operands = 0 : i64, tpu.core_type = #tpu.core_type<tc>, window_params = [{transform_indices = @transform_0, window_bounds = array<i64: 2, 12>}, {pipeline_mode = #tpu.pipeline_mode<synchronous>, transform_indices = @transform_1, window_bounds = array<i64: 12, 256>}, {pipeline_mode = #tpu.pipeline_mode<synchronous>, transform_indices = @transform_2, window_bounds = array<i64: 1, 256>}, {pipeline_mode = #tpu.pipeline_mode<synchronous>, transform_indices = @transform_3, window_bounds = array<i64: 256, 256>}, {pipeline_mode = #tpu.pipeline_mode<synchronous>, transform_indices = @transform_4, window_bounds = array<i64: 1, 256>}, {pipeline_mode = #tpu.pipeline_mode<synchronous>, transform_indices = @transform_5, window_bounds = array<i64: 1, 256>}, {pipeline_mode = #tpu.pipeline_mode<synchronous>, transform_indices = @transform_6, window_bounds = array<i64: 1, 1>}, {transform_indices = @transform_7, window_bounds = array<i64: 2, 1>}]} {
    %c0 = arith.constant 0 : index
    %c0_0 = arith.constant 0 : index
    %0 = vector.load %arg1[%c0, %c0_0] : memref<2x12xbf16, #tpu.memory_space<vmem>>, vector<2x12xbf16>
    %c0_1 = arith.constant 0 : index
    %c0_2 = arith.constant 0 : index
    %1 = vector.load %arg2[%c0_1, %c0_2] : memref<12x256xbf16, #tpu.memory_space<vmem>>, vector<12x256xbf16>
    %cst = arith.constant dense<0.000000e+00> : vector<2x256xf32>
    %2 = tpu.matmul %0, %1, %cst {dimension_numbers = #tpu.dot_dimension_numbers<[1], [0], [0], [1], [0, 0, 1, 1], [], []>} : vector<2x12xbf16>, vector<12x256xbf16>, vector<2x256xf32> -> vector<2x256xf32>
    %c0_3 = arith.constant 0 : index
    %c0_4 = arith.constant 0 : index
    %3 = vector.load %arg3[%c0_3, %c0_4] : memref<1x256xf32, #tpu.memory_space<vmem>>, vector<1x256xf32>
    %4 = vector.broadcast %3 : vector<1x256xf32> to vector<2x256xf32>
    %5 = arith.addf %2, %4 : vector<2x256xf32>
    %cst_5 = arith.constant 0.000000e+00 : f32
    %6 = vector.broadcast %cst_5 : f32 to vector<2x256xf32>
    %7 = arith.maximumf %5, %6 : vector<2x256xf32>
    %8 = arith.truncf %7 : vector<2x256xf32> to vector<2x256xbf16>
    %c0_6 = arith.constant 0 : index
    %c0_7 = arith.constant 0 : index
    %9 = vector.load %arg4[%c0_6, %c0_7] : memref<256x256xbf16, #tpu.memory_space<vmem>>, vector<256x256xbf16>
    %cst_8 = arith.constant dense<0.000000e+00> : vector<2x256xf32>
    %10 = tpu.matmul %8, %9, %cst_8 {dimension_numbers = #tpu.dot_dimension_numbers<[1], [0], [0], [1], [0, 0, 1, 1], [], []>} : vector<2x256xbf16>, vector<256x256xbf16>, vector<2x256xf32> -> vector<2x256xf32>
    %c0_9 = arith.constant 0 : index
    %c0_10 = arith.constant 0 : index
    %11 = vector.load %arg5[%c0_9, %c0_10] : memref<1x256xf32, #tpu.memory_space<vmem>>, vector<1x256xf32>
    %12 = vector.broadcast %11 : vector<1x256xf32> to vector<2x256xf32>
    %13 = arith.addf %10, %12 : vector<2x256xf32>
    %cst_11 = arith.constant 0.000000e+00 : f32
    %14 = vector.broadcast %cst_11 : f32 to vector<2x256xf32>
    %15 = arith.maximumf %13, %14 : vector<2x256xf32>
    %c0_12 = arith.constant 0 : index
    %c0_13 = arith.constant 0 : index
    %16 = vector.load %arg6[%c0_12, %c0_13] : memref<1x256xf32, #tpu.memory_space<vmem>>, vector<1x256xf32>
    %17 = vector.broadcast %16 : vector<1x256xf32> to vector<2x256xf32>
    %18 = arith.mulf %15, %17 : vector<2x256xf32>
    %cst_14 = arith.constant dense<0.000000e+00> : vector<2xf32>
    %19 = vector.multi_reduction <add>, %18, %cst_14 [1] : vector<2x256xf32> to vector<2xf32>
    %20 = vector.shape_cast %19 : vector<2xf32> to vector<2x1xf32>
    %c0_15 = arith.constant 0 : index
    %c0_16 = arith.constant 0 : index
    %21 = vector.load %arg7[%c0_15, %c0_16] : memref<1x1xf32, #tpu.memory_space<vmem>>, vector<1x1xf32>
    %22 = vector.broadcast %21 : vector<1x1xf32> to vector<2x1xf32>
    %23 = arith.addf %20, %22 : vector<2x1xf32>
    %c0_17 = arith.constant 0 : index
    %c0_18 = arith.constant 0 : index
    %24 = vector.load %arg8[%c0_17, %c0_18] : memref<2x1xf32, #tpu.memory_space<vmem>>, vector<2x1xf32>
    tpu.vector_store %arg8[%c0_17, %c0_18], %23 {strides = array<i32>} : memref<2x1xf32, #tpu.memory_space<vmem>>, vector<2x1xf32>,
    return
  }
  func.func @transform_0(%arg0: i32) -> (i32, i32) {
    %c0_i32 = arith.constant 0 : i32
    %c0_i32_0 = arith.constant 0 : i32
    return %arg0, %c0_i32 : i32, i32
  }
  func.func @transform_1(%arg0: i32) -> (i32, i32) {
    %c0_i32 = arith.constant 0 : i32
    %c0_i32_0 = arith.constant 0 : i32
    %c0_i32_1 = arith.constant 0 : i32
    return %c0_i32, %c0_i32_0 : i32, i32
  }
  func.func @transform_2(%arg0: i32) -> (i32, i32) {
    %c0_i32 = arith.constant 0 : i32
    %c0_i32_0 = arith.constant 0 : i32
    %c0_i32_1 = arith.constant 0 : i32
    return %c0_i32, %c0_i32_0 : i32, i32
  }
  func.func @transform_3(%arg0: i32) -> (i32, i32) {
    %c0_i32 = arith.constant 0 : i32
    %c0_i32_0 = arith.constant 0 : i32
    %c0_i32_1 = arith.constant 0 : i32
    return %c0_i32, %c0_i32_0 : i32, i32
  }
  func.func @transform_4(%arg0: i32) -> (i32, i32) {
    %c0_i32 = arith.constant 0 : i32
    %c0_i32_0 = arith.constant 0 : i32
    %c0_i32_1 = arith.constant 0 : i32
    return %c0_i32, %c0_i32_0 : i32, i32
  }
  func.func @transform_5(%arg0: i32) -> (i32, i32) {
    %c0_i32 = arith.constant 0 : i32
    %c0_i32_0 = arith.constant 0 : i32
    %c0_i32_1 = arith.constant 0 : i32
    return %c0_i32, %c0_i32_0 : i32, i32
  }
  func.func @transform_6(%arg0: i32) -> (i32, i32) {
    %c0_i32 = arith.constant 0 : i32
    %c0_i32_0 = arith.constant 0 : i32
    %c0_i32_1 = arith.constant 0 : i32
    return %c0_i32, %c0_i32_0 : i32, i32
  }
  func.func @transform_7(%arg0: i32) -> (i32, i32) {
    %c0_i32 = arith.constant 0 : i32
    %c0_i32_0 = arith.constant 0 : i32
    return %arg0, %c0_i32 : i32, i32
  }
}

</mosaic_0001>

<bundles_post_ra>
// kernel: tpu_custom_call.1
= control target key start
LH: loop header
LB: loop body
LE: loop exit
PB: predicated region body
PF: predicated region fallthrough
CT: control target
= control target key end

     0   :  { %s647_s0 = inlined_call_operand.vmem [shape: bf16[2,12], index: 0, kind: input, shape index: {}]   ;;  %s648_s1 = inlined_call_operand.hbm [shape: bf16[12,256], index: 1, kind: input, shape index: {}]   ;;  %s649_s2 = inlined_call_operand.vmem [shape: f32[1,256], index: 2, kind: input, shape index: {}]   ;;  %s650_s3 = inlined_call_operand.hbm [shape: bf16[256,256], index: 3, kind: input, shape index: {}]   ;;  %s651_s4 = inlined_call_operand.vmem [shape: f32[1,256], index: 4, kind: input, shape index: {}]   ;;  %s652_s5 = inlined_call_operand.vmem [shape: f32[1,256], index: 5, kind: input, shape index: {}]   ;;  %s653_s6 = inlined_call_operand.<no memory space> [shape: f32[1,1], index: 6, kind: input, shape index: {}]   ;;  %s654_s7 = inlined_call_operand.vmem [shape: f32[2,1], index: 7, kind: output, shape index: {}]  }
   0x1   :  { %v12_v0 = vstv %s653_s6 }
   0x2   :  { %13 = vst [vmem:[#allocation2] sm:$0x1] %v12_v0 }
   0x3   :  { %14 = vsyncpa [#allocation4], 0 }
   0x4   :  { %15 = vsyncpa [#allocation6], 0  ;;  %s560_s26 = smov [#allocation3]   ;;  %s512_s30 = scalar_lea.hbm %s648_s1, 256 }
   0x5   :  { %s23_s27 = sshll.u32 %s560_s26, 4  ;;  %p513_p0 = scmp.ne.s32.totalorder %s648_s1, %s512_s30  ;;  %s24_s27 = int_to_ptr.vmem [resolvable:$true] %s23_s27 }
   0x6   :  { %p516_p1 = scmp.lt.u32.totalorder %s512_s30, %s648_s1 }
   0x8   :  { %p518_p2 = pnand %p516_p1, %p513_p0 }
   0xa   :  { %521 = shalt.err (!%p518_p2)
}
   0xb   :  { %s522_s6 = scalar_lea.vmem %s24_s27, 256  ;;  %p527_p4 = scmp.lt.s32.totalorder %s24_s27, %s24_s27 }
   0xc   :  { %p523_p3 = scmp.ne.s32.totalorder %s24_s27, %s522_s6  ;;  %p528_p5 = scmp.lt.s32.totalorder %s522_s6, %s522_s6 }
   0xe   :  { %p529_p6 = por %p528_p5, %p527_p4 }
  0x10   :  { %p530_p7 = pnand %p529_p6, %p523_p3 }
  0x12   :  { %533 = shalt.err (!%p530_p7)
}
  0x13   :  { %s561_s12 = smov 128   ;;  %s562_s13 = smov 8  }
  0x14   :  { %29 = dma.hbm_to_vmem [thread:$0]  %s648_s1, 256, %s24_s27, [#allocation4], %s561_s12, %s561_s12, %s562_s13  }
  0x15   :  { %s563_s16 = smov [#allocation5]   ;;  %s534_s20 = scalar_lea.hbm %s650_s3, 4096 }
  0x16   :  { %s37_s17 = sshll.u32 %s563_s16, 4  ;;  %p535_p8 = scmp.ne.s32.totalorder %s650_s3, %s534_s20  ;;  %s38_s17 = int_to_ptr.vmem [resolvable:$true] %s37_s17 }
  0x17   :  { %p538_p9 = scmp.lt.u32.totalorder %s534_s20, %s650_s3 }
  0x19   :  { %p540_p10 = pnand %p538_p9, %p535_p8 }
  0x1b   :  { %543 = shalt.err (!%p540_p10)
}
  0x1c   :  { %s544_s25 = scalar_lea.vmem %s38_s17, 4096  ;;  %p549_p12 = scmp.lt.s32.totalorder %s38_s17, %s38_s17 }
  0x1d   :  { %p545_p11 = scmp.ne.s32.totalorder %s38_s17, %s544_s25  ;;  %p550_p13 = scmp.lt.s32.totalorder %s544_s25, %s544_s25 }
  0x1f   :  { %p551_p0 = por %p550_p13, %p549_p12 }
  0x21   :  { %p552_p1 = pnand %p551_p0, %p545_p11 }
  0x23   :  { %555 = shalt.err (!%p552_p1)
}
  0x24   :  { %43 = dma.hbm_to_vmem [thread:$0]  %s650_s3, 4096, %s38_s17, [#allocation6], %s561_s12, %s561_s12, %s562_s13  }
  0x25   :  { %556 = dma.done.wait [#allocation4], 256  }
  0x26   :  { %557 = vsyncadd [#allocation4], 4294967040 }
  0x27   :  { %558 = dma.done.wait [#allocation6], 4096  }
  0x28   :  { %559 = vsyncadd [#allocation6], 4294963200  ;;  %v564_v1 = vmov 0   ;;  %vm84_vm0 = vcmask 1045504   ;;  %v464_v4 = vld [vmem:[#allocation5 + $0x4] ss:$8 sps:$4 sm:$0xff]   ;;  %v62_v38 = vlaneseq }
  0x29   :  { %123 = vmatprep.mubr.bf16.mxu0 %v564_v1  ;;  %v461_v2 = vld [vmem:[#allocation3 + $0x4] ss:$8 sps:$4 sm:$0x3f]   ;;  %v463_v3 = vld [vmem:[#allocation3] ss:$8 sps:$4 sm:$0x3f]   ;;  %340 = vmatprep.subr.bf16.mxu1 %v464_v4 }
  0x2a   :  { %421 = vmatprep.subr.msk.bf16.mxu0 %vm84_vm0, %v461_v2  ;;  %v466_v5 = vld [vmem:[#allocation5] ss:$8 sps:$4 sm:$0xff]   ;;  %v86_v6 = vsel %vm84_vm0, %v463_v3, 0  ;;  %v467_v7 = vld [vmem:[#allocation5 + $0x14] ss:$8 sps:$4 sm:$0xff]   ;;  %vm80_vm1 = vcmask 97280  }
  0x2b   :  { %92 = vmatpush1.bf16.msra.mxu0 %v86_v6  ;;  %v57_v8 = vld [vmem:[%s647_s0] sm:$0x1]  ;;  %341 = vmatpush1.bf16.msra.mxu1 %v466_v5  ;;  %v469_v9 = vld [vmem:[#allocation5 + $0x10] ss:$8 sps:$4 sm:$0xff]   ;;  %v472_v11 = vld [vmem:[#allocation5 + $0x20] ss:$8 sps:$4 sm:$0xff]  }
  0x2c   :  { %342 = vmatprep.subr.bf16.mxu1 %v467_v7  ;;  %v470_v10 = vld [vmem:[#allocation5 + $0x24] ss:$8 sps:$4 sm:$0xff]   ;;  %v473_v12 = vld [vmem:[#allocation5 + $0x34] ss:$8 sps:$4 sm:$0xff]   ;;  %v475_v13 = vld [vmem:[#allocation5 + $0x30] ss:$8 sps:$4 sm:$0xff]  }
  0x2d   :  { %v476_v14 = vld [vmem:[#allocation5 + $0x44] ss:$8 sps:$4 sm:$0xff]   ;;  %v478_v15 = vld [vmem:[#allocation5 + $0x40] ss:$8 sps:$4 sm:$0xff]   ;;  %v479_v16 = vld [vmem:[#allocation5 + $0x54] ss:$8 sps:$4 sm:$0xff]  }
  0x2e   :  { %422 = vmatmul.mubr.msk.bf16.vlgmr.msra.gmra.mrb[0].mxu0 %vm80_vm1, %v57_v8  ;;  %v481_v17 = vld [vmem:[#allocation5 + $0x50] ss:$8 sps:$4 sm:$0xff]   ;;  %v482_v18 = vld [vmem:[#allocation5 + $0x64] ss:$8 sps:$4 sm:$0xff]   ;;  %v484_v19 = vld [vmem:[#allocation5 + $0x60] ss:$8 sps:$4 sm:$0xff]  }
  0x2f   :  { %343 = vmatpush1.bf16.msra.mxu1 %v469_v9  ;;  %v485_v20 = vld [vmem:[#allocation5 + $0x74] ss:$8 sps:$4 sm:$0xff]   ;;  %v487_v21 = vld [vmem:[#allocation5 + $0x70] ss:$8 sps:$4 sm:$0xff]   ;;  %v488_v22 = vld [vmem:[#allocation5 + $0x84] ss:$8 sps:$4 sm:$0xff]  }
  0x30   :  { %344 = vmatprep.subr.bf16.mxu1 %v470_v10  ;;  %v490_v23 = vld [vmem:[#allocation5 + $0x80] ss:$8 sps:$4 sm:$0xff]   ;;  %v491_v24 = vld [vmem:[#allocation5 + $0x94] ss:$8 sps:$4 sm:$0xff]   ;;  %v493_v25 = vld [vmem:[#allocation5 + $0x90] ss:$8 sps:$4 sm:$0xff]  }
  0x31   :  { %v494_v26 = vld [vmem:[#allocation5 + $0xa4] ss:$8 sps:$4 sm:$0xff]   ;;  %v496_v27 = vld [vmem:[#allocation5 + $0xa0] ss:$8 sps:$4 sm:$0xff]   ;;  %v497_v28 = vld [vmem:[#allocation5 + $0xb4] ss:$8 sps:$4 sm:$0xff]  }
  0x32   :  { %v499_v29 = vld [vmem:[#allocation5 + $0xb0] ss:$8 sps:$4 sm:$0xff]   ;;  %v500_v30 = vld [vmem:[#allocation5 + $0xc4] ss:$8 sps:$4 sm:$0xff]   ;;  %v502_v31 = vld [vmem:[#allocation5 + $0xc0] ss:$8 sps:$4 sm:$0xff]  }
  0x33   :  { %345 = vmatpush1.bf16.msra.mxu1 %v472_v11  ;;  %v503_v32 = vld [vmem:[#allocation5 + $0xd4] ss:$8 sps:$4 sm:$0xff]   ;;  %v505_v33 = vld [vmem:[#allocation5 + $0xd0] ss:$8 sps:$4 sm:$0xff]   ;;  %v506_v34 = vld [vmem:[#allocation5 + $0xe4] ss:$8 sps:$4 sm:$0xff]  }
  0x34   :  { %346 = vmatprep.subr.bf16.mxu1 %v473_v12  ;;  %v508_v35 = vld [vmem:[#allocation5 + $0xe0] ss:$8 sps:$4 sm:$0xff]   ;;  %v509_v36 = vld [vmem:[#allocation5 + $0xf4] ss:$8 sps:$4 sm:$0xff]   ;;  %v511_v37 = vld [vmem:[#allocation5 + $0xf0] ss:$8 sps:$4 sm:$0xff]  }
  0x35   :  { %v63_v39 = vshrl.u32 %v62_v38, 7  ;;  %v60_v41 = vld [vmem:[%s649_s2] sm:$0x3]  ;;  %vm397_vm2 = vcmask 1041408   ;;  %vm411_vm3 = vcmask 1024  }
  0x36   :  { %v168_v55 = vld [vmem:[%s651_s4] sm:$0x3] }
  0x37   :  { %347 = vmatpush1.bf16.msra.mxu1 %v475_v13  ;;  %v64_v40 = vsub.s32 0, %v63_v39  ;;  %v68_v42 = vsub.s32 1, %v63_v39  ;;  %v383_v58 = vld [vmem:[%s652_s5] sm:$0x3] }
  0x38   :  { %348 = vmatprep.subr.bf16.mxu1 %v476_v14  ;;  %v455_v10 = vld [vmem:[#allocation2] ss:$0 sm:$0xff] }
  0x39   :  { %v65_v43 = vrot.slane %v60_v41, %v64_v40  ;;  %v69_v44 = vrot.slane %v60_v41, %v68_v42  ;;  %v173_v56 = vrot.slane %v168_v55, %v64_v40  ;;  %v177_v57 = vrot.slane %v168_v55, %v68_v42 }
  0x3a   :  { %v388_v62 = vrot.slane %v383_v58, %v64_v40  ;;  %v392_v1 = vrot.slane %v383_v58, %v68_v42 }
  0x3b   :  { %349 = vmatpush1.bf16.msra.mxu1 %v478_v15 }
  0x3c   :  { %350 = vmatprep.subr.bf16.mxu1 %v479_v16 }
  0x3f   :  { %351 = vmatpush1.bf16.msra.mxu1 %v481_v17 }
  0x40   :  { %352 = vmatprep.subr.bf16.mxu1 %v482_v18 }
  0x43   :  { %353 = vmatpush1.bf16.msra.mxu1 %v484_v19 }
  0x44   :  { %354 = vmatprep.subr.bf16.mxu1 %v485_v20 }
  0x47   :  { %355 = vmatpush1.bf16.msra.mxu1 %v487_v21 }
  0x48   :  { %356 = vmatprep.subr.bf16.mxu1 %v488_v22 }
  0x4b   :  { %357 = vmatpush1.bf16.msra.mxu1 %v490_v23 }
  0x4c   :  { %358 = vmatprep.subr.bf16.mxu1 %v491_v24 }
  0x4f   :  { %359 = vmatpush1.bf16.msra.mxu1 %v493_v25 }
  0x50   :  { %360 = vmatprep.subr.bf16.mxu1 %v494_v26 }
  0x53   :  { %361 = vmatpush1.bf16.msra.mxu1 %v496_v27 }
  0x54   :  { %362 = vmatprep.subr.bf16.mxu1 %v497_v28 }
  0x57   :  { %363 = vmatpush1.bf16.msra.mxu1 %v499_v29 }
  0x58   :  { %364 = vmatprep.subr.bf16.mxu1 %v500_v30 }
  0x5b   :  { %365 = vmatpush1.bf16.msra.mxu1 %v502_v31 }
  0x5c   :  { %366 = vmatprep.subr.bf16.mxu1 %v503_v32 }
  0x5f   :  { %367 = vmatpush1.bf16.msra.mxu1 %v505_v33 }
  0x60   :  { %368 = vmatprep.subr.bf16.mxu1 %v506_v34 }
  0x63   :  { %369 = vmatpush1.bf16.msra.mxu1 %v508_v35 }
  0x64   :  { %370 = vmatprep.subr.bf16.mxu1 %v509_v36 }
  0x67   :  { %371 = vmatpush1.bf16.msra.mxu1 %v511_v37 }
 0x101   :  { %v125_v45 = vpop.f32.mrb[0].mxu0 }
 0x102   :  { %v126_v46 = vadd.f32 %v125_v45, %v65_v43  ;;  %v127_v47 = vpop.f32.mrb[1].mxu0 }
 0x103   :  { %v128_v48 = vadd.f32 %v127_v47, %v69_v44  ;;  %v129_v49 = vpop.f32.mrb[2].mxu0 }
 0x104   :  { %v132_v50 = vmax.f32 %v126_v46, 0.0  ;;  %v130_v51 = vpop.f32.mrb[3].mxu0 }
 0x105   :  { %v133_v52 = vmax.f32 %v128_v48, 0.0 }
 0x106   :  { %v134_v54 = vpack.c.bf16 %v132_v50, %v132_v50 }
 0x107   :  { %v135_v53 = vpack.c.bf16 %v133_v52, %v133_v52 }
 0x109   :  { %372 = vmatprep.mubr.bf16.mxu1 %v135_v53 }
 0x10a   :  { %373 = vmatmul.mubr.bf16.vlgmr.msra.gmra.mrb[0].mxu1 %v134_v54 }
 0x1dd   :  { %v374_v59 = vpop.f32.mrb[0].mxu1 }
 0x1de   :  { %v375_v60 = vadd.f32 %v374_v59, %v173_v56  ;;  %v376_v61 = vpop.f32.mrb[1].mxu1 }
 0x1df   :  { %v377_v63 = vadd.f32 %v376_v61, %v177_v57  ;;  %v378_v0 = vpop.f32.mrb[2].mxu1 }
 0x1e0   :  { %v381_v2 = vmax.f32 %v375_v60, 0.0  ;;  %v379_v3 = vpop.f32.mrb[3].mxu1 }
 0x1e1   :  { %v382_v4 = vmax.f32 %v377_v63, 0.0 }
 0x1e2   :  { %v395_v5 = vmul.f32 %v388_v62, %v381_v2 }
 0x1e3   :  { %v396_v6 = vmul.f32 %v392_v1, %v382_v4 }
 0x1e4   :  { %v398_v7 = vsel %vm397_vm2, %v395_v5, 0.0 }
 0x1e5   :  { %v399_v8 = vsel %vm397_vm2, %v396_v6, 0.0 }
 0x1e6   :  { %v400_v9 = vadd.f32 %v399_v8, %v398_v7 }
 0x1e8   :  { %401 = vadd.xlane.f32.xlu0 %v400_v9 }
 0x275   :  { %v402_v11 = vpop.xlane.xlu0 %401 }
 0x276   :  { %v410_v12 = vadd.f32 %v455_v10, %v402_v11 }
 0x278   :  { %412 = vst.msk [vmem:[%s654_s7] sm:$0x3] %vm411_vm3, %v410_v12 }
 0x279   :  { %417 = vsyncpa [#allocation4], 1 }
 0x27a   :  { %418 = vsyncpa [#allocation6], 1 }

</bundles_post_ra>
